<compile_context>
chip_gen: v6e
topology: v6e:2x2x1
jax: 0.10.0
libtpu: 0.0.40
codegen_flags: <defaults>
</compile_context>

<pallas_src>
import functools

import jax
import jax.numpy as jnp
from jax.experimental import pallas as pl
from jax.experimental.pallas import tpu as pltpu


def _vq_kernel(z_ref, e_m2_ref, e_t_ref, e_sq_ref, zq_ref, sse_ref,
               *, hw_valid, masked):
    i = pl.program_id(1)               # pixel-tile index within the image
    tm = z_ref.shape[1]

    z = z_ref[...]                     # (D, tm)  input dtype
    e_m2 = e_m2_ref[...]               # (K, D)   f32, = -2 * E   (hoisted)
    e_t = e_t_ref[...]                 # (D, K)
    e_sq = e_sq_ref[...]               # (K, 1)   f32, = ||E||^2  (hoisted)

    # Squared distance up to a per-pixel constant (argmin-invariant):
    #   dist[k, t] = ||e_k||^2 - 2 * e_k . z_t
    dist = e_sq + jnp.dot(e_m2, z, preferred_element_type=jnp.float32)   # (K, tm)

    n_codes = dist.shape[0]
    k_iota = jax.lax.broadcasted_iota(jnp.int32, dist.shape, 0)          # (K, tm)
    min_d = jnp.min(dist, axis=0, keepdims=True)                         # XLU sublane reduce
    cand = jnp.where(dist <= min_d, k_iota, n_codes)                     # (K, tm)
    best = jnp.min(cand, axis=0, keepdims=True)                          # first-index argmin
    onehot = (cand == best).astype(e_t.dtype)                            # exactly one 1 / col

    # Gather selected codes: (D, K) @ (K, tm) -> (D, tm)
    z_q = jnp.dot(e_t, onehot, preferred_element_type=jnp.float32)

    z_f32 = z.astype(jnp.float32)
    diff = z_q - z_f32

    # Straight-through forward value: z + (z_q - z)
    zq_ref[...] = (z_f32 + diff).astype(zq_ref.dtype)

    sq = diff * diff
    if masked:  # static: only when H*W was padded; only the last tile has pad
        last = pl.num_programs(1) - 1

        @pl.when(i == last)
        def _():
            col = i * tm + jax.lax.broadcasted_iota(jnp.int32, (1, tm), 1)
            sse_ref[...] = jnp.broadcast_to(
                jnp.sum(jnp.where(col < hw_valid, sq, 0.0)), sse_ref.shape)

        @pl.when(i != last)
        def _():
            sse_ref[...] = jnp.broadcast_to(jnp.sum(sq), sse_ref.shape)
    else:
        sse_ref[...] = jnp.broadcast_to(jnp.sum(sq), sse_ref.shape)


@functools.partial(jax.jit, static_argnames=("beta", "tm"))
def vector_quantize(z, embedding, beta=0.25, tm=8192):
    """z: (B, C, H, W) NCHW (PyTorch convention); embedding: (n_e, C)."""
    B, C, H, W = z.shape
    K, D = embedding.shape
    assert D == C
    assert tm % 128 == 0, "tm must be lane-aligned (multiple of 128)"

    HW = H * W
    hw_lane = ((HW + 127) // 128) * 128      # lane-aligned pixel count per image
    tm_eff = min(tm, hw_lane)                # clamp tile to the image size
    num_tiles = pl.cdiv(HW, tm_eff)
    HW_pad = num_tiles * tm_eff
    masked = HW_pad != HW

    # Free view of NCHW; no transpose, no extra HBM pass.
    z_flat = z.reshape(B, C, HW)
    if masked:
        z_flat = jnp.pad(z_flat, ((0, 0), (0, 0), (0, HW_pad - HW)))

    # Hoisted codebook constants (tiny; constant index_map -> fetched once).
    e_f32 = embedding.astype(jnp.float32)
    e_m2 = -2.0 * e_f32                                       # (K, D) f32
    e_sq = jnp.sum(e_f32 * e_f32, axis=1, keepdims=True)      # (K, 1) f32
    e_t = jnp.transpose(embedding, (1, 0))                    # (D, K)

    kernel = functools.partial(_vq_kernel, hw_valid=HW, masked=masked)

    zq_flat, sse_part = pl.pallas_call(
        kernel,
        out_shape=(
            jax.ShapeDtypeStruct((B, D, HW_pad), z.dtype),
            jax.ShapeDtypeStruct((B, num_tiles, 8, 128), jnp.float32),
        ),
        grid_spec=pltpu.PrefetchScalarGridSpec(
            num_scalar_prefetch=0,
            grid=(B, num_tiles),
            in_specs=[
                # z tile: lane-dense (D, tm) slab of one image
                pl.BlockSpec((pl.Squeezed(), D, tm_eff), lambda b, i: (b, 0, i)),
                pl.BlockSpec((K, D), lambda b, i: (0, 0)),    # -2 * codebook
                pl.BlockSpec((D, K), lambda b, i: (0, 0)),    # codebook^T
                pl.BlockSpec((K, 1), lambda b, i: (0, 0)),    # ||E||^2
            ],
            out_specs=(
                pl.BlockSpec((pl.Squeezed(), D, tm_eff), lambda b, i: (b, 0, i)),
                pl.BlockSpec((pl.Squeezed(), pl.Squeezed(), 8, 128),
                             lambda b, i: (b, i, 0, 0)),      # per-tile SSE
            ),
        ),
        compiler_params=pltpu.CompilerParams(
            dimension_semantics=("parallel", "parallel"),
            # Default scoped VMEM is plenty at tm<=8192 (v5e 16 MiB); only bump
            # it for explicitly requested larger tiles (stay < v7x's 64 MiB).
            vmem_limit_bytes=(48 * 1024 * 1024 if tm_eff > 8192 else None),
        ),
    )(z_flat, e_m2, e_t, e_sq)

    sse = jnp.sum(sse_part[:, :, 0, 0])
    mse = sse / (B * HW * D)
    loss = beta * mse + mse            # forward value only (see TODO above)

    z_q = zq_flat[:, :, :HW].reshape(B, D, H, W)
    return z_q, loss


def _reference(z, embedding, beta=0.25):
    """Pure-JAX reference mirroring the PyTorch forward."""
    B, C, H, W = z.shape
    z_nhwc = jnp.transpose(z, (0, 2, 3, 1))
    zf = z_nhwc.reshape(-1, C)
    d = (jnp.sum(zf**2, 1, keepdims=True)
         - 2.0 * zf @ embedding.T
         + jnp.sum(embedding**2, 1)[None, :])
    idx = jnp.argmin(d, axis=1)
    z_q = embedding[idx].reshape(z_nhwc.shape)
    loss = beta * jnp.mean((z_q - z_nhwc) ** 2) + jnp.mean((z_q - z_nhwc) ** 2)
    z_q = z_nhwc + (z_q - z_nhwc)
    return jnp.transpose(z_q, (0, 3, 1, 2)), loss


if __name__ == "__main__":
    n_e = 32           # codebook size
    vq_embed_dim = 8   # embedding dim == channels
    beta = 0.25

    key = jax.random.PRNGKey(0)
    k_z1, k_z2, k_e = jax.random.split(key, 3)

    # Deterministic init mirroring nn.Embedding.weight.uniform_(-1/n_e, 1/n_e)
    embedding = jax.random.uniform(
        k_e, (n_e, vq_embed_dim), jnp.float32,
        minval=-1.0 / n_e, maxval=1.0 / n_e)

    # Case 1: B=2, H=W=16 -> 256 pixels/image, single lane-aligned tile, no pad.
    z1 = jax.random.normal(k_z1, (2, vq_embed_dim, 16, 16), jnp.float32)
    zq1, loss1 = vector_quantize(z1, embedding, beta=beta)
    jax.block_until_ready((zq1, loss1))
    zq1_ref, loss1_ref = _reference(z1, embedding, beta=beta)
    assert zq1.shape == z1.shape
    assert jnp.allclose(zq1, zq1_ref, atol=1e-5), "z_q mismatch (case 1)"
    assert jnp.allclose(loss1, loss1_ref, atol=1e-5, rtol=1e-5), "loss mismatch (case 1)"

    # Case 2: ragged 12x12 = 144 pixels/image with tm=128 -> 2 tiles per image;
    # exercises the last-tile-only padding mask and the multi-tile parallel grid.
    z2 = jax.random.normal(k_z2, (2, vq_embed_dim, 12, 12), jnp.float32)
    zq2, loss2 = vector_quantize(z2, embedding, beta=beta, tm=128)
    jax.block_until_ready((zq2, loss2))
    zq2_ref, loss2_ref = _reference(z2, embedding, beta=beta)
    assert zq2.shape == z2.shape
    assert jnp.allclose(zq2, zq2_ref, atol=1e-5), "z_q mismatch (case 2)"
    assert jnp.allclose(loss2, loss2_ref, atol=1e-5, rtol=1e-5), "loss mismatch (case 2)"

    print("KERNEL_OK")
</pallas_src>

<mosaic_0001>
module attributes {stable_mosaic.version = 11 : i64} {
  func.func @_vq_kernel(%arg0: i32, %arg1: i32, %arg2: memref<1x8x256xf32, #tpu.memory_space<vmem>>, %arg3: memref<32x8xf32, #tpu.memory_space<vmem>>, %arg4: memref<8x32xf32, #tpu.memory_space<vmem>>, %arg5: memref<32x1xf32, #tpu.memory_space<vmem>>, %arg6: memref<1x8x256xf32, #tpu.memory_space<vmem>>, %arg7: memref<1x1x8x128xf32, #tpu.memory_space<vmem>>) attributes {dimension_semantics = [#tpu.dimension_semantics<parallel>, #tpu.dimension_semantics<parallel>], iteration_bounds = array<i64: 2, 1>, scalar_prefetch = 0 : i64, scratch_operands = 0 : i64, tpu.core_type = #tpu.core_type<tc>, window_params = [{transform_indices = @transform_0, window_bounds = array<i64: 1, 8, 256>}, {pipeline_mode = #tpu.pipeline_mode<synchronous>, transform_indices = @transform_1, window_bounds = array<i64: 32, 8>}, {pipeline_mode = #tpu.pipeline_mode<synchronous>, transform_indices = @transform_2, window_bounds = array<i64: 8, 32>}, {pipeline_mode = #tpu.pipeline_mode<synchronous>, transform_indices = @transform_3, window_bounds = array<i64: 32, 1>}, {transform_indices = @transform_4, window_bounds = array<i64: 1, 8, 256>}, {transform_indices = @transform_5, window_bounds = array<i64: 1, 1, 8, 128>}]} {
    %c0 = arith.constant 0 : index
    %c0_0 = arith.constant 0 : index
    %c0_1 = arith.constant 0 : index
    %0 = vector.load %arg2[%c0, %c0_0, %c0_1] : memref<1x8x256xf32, #tpu.memory_space<vmem>>, vector<1x8x256xf32>
    %1 = vector.shape_cast %0 : vector<1x8x256xf32> to vector<8x256xf32>
    %c0_2 = arith.constant 0 : index
    %c0_3 = arith.constant 0 : index
    %2 = vector.load %arg3[%c0_2, %c0_3] : memref<32x8xf32, #tpu.memory_space<vmem>>, vector<32x8xf32>
    %c0_4 = arith.constant 0 : index
    %c0_5 = arith.constant 0 : index
    %3 = vector.load %arg4[%c0_4, %c0_5] : memref<8x32xf32, #tpu.memory_space<vmem>>, vector<8x32xf32>
    %c0_6 = arith.constant 0 : index
    %c0_7 = arith.constant 0 : index
    %4 = vector.load %arg5[%c0_6, %c0_7] : memref<32x1xf32, #tpu.memory_space<vmem>>, vector<32x1xf32>
    %cst = arith.constant dense<0.000000e+00> : vector<32x256xf32>
    %5 = tpu.matmul %2, %1, %cst {dimension_numbers = #tpu.dot_dimension_numbers<[1], [0], [0], [1], [0, 0, 1, 1], [], []>} : vector<32x8xf32>, vector<8x256xf32>, vector<32x256xf32> -> vector<32x256xf32>
    %6 = vector.broadcast %4 : vector<32x1xf32> to vector<32x256xf32>
    %7 = arith.addf %6, %5 : vector<32x256xf32>
    %8 = tpu.iota {dimensions = array<i32: 0>} : vector<32x256xi32>
    %cst_8 = arith.constant dense<0x7F800000> : vector<256xf32>
    %9 = vector.multi_reduction <minimumf>, %7, %cst_8 [0] : vector<32x256xf32> to vector<256xf32>
    %10 = vector.shape_cast %9 : vector<256xf32> to vector<1x256xf32>
    %11 = vector.broadcast %10 : vector<1x256xf32> to vector<32x256xf32>
    %12 = arith.cmpf ole, %7, %11 : vector<32x256xf32>
    %c32_i32 = arith.constant 32 : i32
    %13 = vector.broadcast %c32_i32 : i32 to vector<32x256xi32>
    %14 = arith.select %12, %8, %13 : vector<32x256xi1>, vector<32x256xi32>
    %cst_9 = arith.constant dense<2147483647> : vector<256xi32>
    %15 = vector.multi_reduction <minsi>, %14, %cst_9 [0] : vector<32x256xi32> to vector<256xi32>
    %16 = vector.shape_cast %15 : vector<256xi32> to vector<1x256xi32>
    %17 = vector.broadcast %16 : vector<1x256xi32> to vector<32x256xi32>
    %18 = arith.cmpi eq, %14, %17 : vector<32x256xi32>
    %19 = arith.extui %18 : vector<32x256xi1> to vector<32x256xi32>
    %20 = arith.sitofp %19 : vector<32x256xi32> to vector<32x256xf32>
    %cst_10 = arith.constant dense<0.000000e+00> : vector<8x256xf32>
    %21 = tpu.matmul %3, %20, %cst_10 {dimension_numbers = #tpu.dot_dimension_numbers<[1], [0], [0], [1], [0, 0, 1, 1], [], []>} : vector<8x32xf32>, vector<32x256xf32>, vector<8x256xf32> -> vector<8x256xf32>
    %22 = arith.subf %21, %1 : vector<8x256xf32>
    %23 = arith.addf %1, %22 : vector<8x256xf32>
    %c0_11 = arith.constant 0 : index
    %c0_12 = arith.constant 0 : index
    %c0_13 = arith.constant 0 : index
    %24 = vector.load %arg6[%c0_11, %c0_12, %c0_13] : memref<1x8x256xf32, #tpu.memory_space<vmem>>, vector<1x8x256xf32>
    %25 = vector.shape_cast %24 : vector<1x8x256xf32> to vector<8x256xf32>
    %26 = vector.shape_cast %23 : vector<8x256xf32> to vector<1x8x256xf32>
    tpu.vector_store %arg6[%c0_11, %c0_12, %c0_13], %26 {strides = array<i32>} : memref<1x8x256xf32, #tpu.memory_space<vmem>>, vector<1x8x256xf32>,
    %27 = arith.mulf %22, %22 : vector<8x256xf32>
    %28 = vector.shape_cast %27 : vector<8x256xf32> to vector<1x8x256xf32>
    %cst_14 = arith.constant dense<0.000000e+00> : vector<1xf32>
    %29 = vector.multi_reduction <add>, %28, %cst_14 [1, 2] : vector<1x8x256xf32> to vector<1xf32>
    %30 = vector.shape_cast %29 : vector<1xf32> to vector<1x1x1xf32>
    %31 = vector.extract %30[0, 0, 0] : f32 from vector<1x1x1xf32>
    %32 = vector.broadcast %31 : f32 to vector<8x128xf32>
    %c0_15 = arith.constant 0 : index
    %c0_16 = arith.constant 0 : index
    %c0_17 = arith.constant 0 : index
    %c0_18 = arith.constant 0 : index
    %33 = vector.load %arg7[%c0_15, %c0_16, %c0_17, %c0_18] : memref<1x1x8x128xf32, #tpu.memory_space<vmem>>, vector<1x1x8x128xf32>
    %34 = vector.shape_cast %33 : vector<1x1x8x128xf32> to vector<8x128xf32>
    %35 = vector.shape_cast %32 : vector<8x128xf32> to vector<1x1x8x128xf32>
    tpu.vector_store %arg7[%c0_15, %c0_16, %c0_17, %c0_18], %35 {strides = array<i32>} : memref<1x1x8x128xf32, #tpu.memory_space<vmem>>, vector<1x1x8x128xf32>,
    return
  }
  func.func @transform_0(%arg0: i32, %arg1: i32) -> (i32, i32, i32) {
    %c0_i32 = arith.constant 0 : i32
    %c0_i32_0 = arith.constant 0 : i32
    return %arg0, %c0_i32, %arg1 : i32, i32, i32
  }
  func.func @transform_1(%arg0: i32, %arg1: i32) -> (i32, i32) {
    %c0_i32 = arith.constant 0 : i32
    %c0_i32_0 = arith.constant 0 : i32
    %c0_i32_1 = arith.constant 0 : i32
    return %c0_i32, %c0_i32_0 : i32, i32
  }
  func.func @transform_2(%arg0: i32, %arg1: i32) -> (i32, i32) {
    %c0_i32 = arith.constant 0 : i32
    %c0_i32_0 = arith.constant 0 : i32
    %c0_i32_1 = arith.constant 0 : i32
    return %c0_i32, %c0_i32_0 : i32, i32
  }
  func.func @transform_3(%arg0: i32, %arg1: i32) -> (i32, i32) {
    %c0_i32 = arith.constant 0 : i32
    %c0_i32_0 = arith.constant 0 : i32
    %c0_i32_1 = arith.constant 0 : i32
    return %c0_i32, %c0_i32_0 : i32, i32
  }
  func.func @transform_4(%arg0: i32, %arg1: i32) -> (i32, i32, i32) {
    %c0_i32 = arith.constant 0 : i32
    %c0_i32_0 = arith.constant 0 : i32
    return %arg0, %c0_i32, %arg1 : i32, i32, i32
  }
  func.func @transform_5(%arg0: i32, %arg1: i32) -> (i32, i32, i32, i32) {
    %c0_i32 = arith.constant 0 : i32
    %c0_i32_0 = arith.constant 0 : i32
    %c0_i32_1 = arith.constant 0 : i32
    return %arg0, %arg1, %c0_i32, %c0_i32_0 : i32, i32, i32, i32
  }
}

</mosaic_0001>

<bundles_post_ra>
// kernel: vector_quantize.1
= control target key start
LH: loop header
LB: loop body
LE: loop exit
PB: predicated region body
PF: predicated region fallthrough
CT: control target
= control target key end

     0   :  { %s863_s18 = smov 0   ;;  %s865_s19 = smov 0   ;;  %s944_s0 = inlined_call_operand.vmem [shape: f32[2,8,256], index: 0, kind: input, shape index: {}]   ;;  %s945_s1 = inlined_call_operand.vmem [shape: f32[32,8], index: 1, kind: input, shape index: {}]   ;;  %s946_s2 = inlined_call_operand.vmem [shape: f32[8,32], index: 2, kind: input, shape index: {}]   ;;  %s947_s3 = inlined_call_operand.vmem [shape: f32[32,1], index: 3, kind: input, shape index: {}]   ;;  %s948_s4 = inlined_call_operand.vmem [shape: f32[2,8,256], index: 4, kind: output, shape index: {0}]   ;;  %s949_s5 = inlined_call_operand.vmem [shape: f32[2,1,8,128], index: 5, kind: output, shape index: {1}]  }
   0x1   :  { %s867_s20 = smov 0  }
   0x2 LB: > { %s28_s21 = sadd.s32 1, %s824_s19  ;;  %p744_p0 = scmp.ge.s32.totalorder %s828_s20, 1  ;;  %s828_s20 = sphi %s867_s20, %s16_s20   ;;  %s824_s19 = sphi %s865_s19, %s951_s19   ;;  %s820_s18 = sphi %s863_s18, %s950_s18  }
   0x3   : > { %p30_p1 = scmp.ge.s32.totalorder %s28_s21, 2  ;;  %p213_p2 = scmp.lt.s32.totalorder %s828_s20, 3 }
   0x5   : > { %s953_s21 = smov (%p30_p1, %s28_s21), 0  ;;  %p214_p3 = pnand %p744_p0, %p213_p2 }
   0x6   : > { %p257_p4 = scmp.lt.s32.totalorder (!%p214_p3), %s820_s18, 1 }
   0x7   : > { %217 = sbr.rel (%p214_p3) target bundleno = 676 (0x2a4), region = 36 }
   0xc   : > { %v830_v0 = vmov 0.0   ;;  %v290_v1 = vld [vmem:[%s947_s3] sm:$0xff]  ;;  %s955_s18 = smov (!%p257_p4, %s820_s18), 1  ;;  %v831_v2 = vmov 0   ;;  %v292_v3 = vld [vmem:[%s947_s3 + $0x10] sm:$0xff]  ;;  %v291_v4 = vld [vmem:[%s947_s3 + $0x8] sm:$0xff]  ;;  %v424_v39 = vlaneseq }
   0xd   : > { %371 = vmatprep.mubr.f32.mxu0 %v830_v0  ;;  %585 = vmatprep.mubr.f32.mxu1 %v830_v0  ;;  %s773_s26 = sshll.u32 %s955_s18, 4  ;;  %v293_v5 = vld [vmem:[%s947_s3 + $0x18] sm:$0xff]  ;;  %v285_v8 = vld [vmem:[%s945_s1] sm:$0xff]  ;;  %vm294_vm0 = vcmask 64512   ;;  %v286_v9 = vld [vmem:[%s945_s1 + $0x8] sm:$0xff] }
   0xe   : > { %804 = vset.pattern.permute.xlu0 %v831_v2  ;;  %805 = vset.pattern.permute.xlu1 %v831_v2  ;;  %s264_s6 = scalar_lea.vmem %s944_s0, %s773_s26  ;;  %v287_v10 = vld [vmem:[%s945_s1 + $0x10] sm:$0xff]  ;;  %v288_v11 = vld [vmem:[%s945_s1 + $0x18] sm:$0xff]  ;;  %v425_v44 = vshrl.u32 %v424_v39, 7  ;;  %s274_s25 = scalar_lea.vmem %s948_s4, %s773_s26 }
   0xf   : > { %398 = vperm.xlu0 %804, %v290_v1   ;;  %408 = vperm.xlu1 %805, %v292_v3   ;;  %v901_v6 = vld [vmem:[%s264_s6 + $0x8] sm:$0xff]  ;;  %v903_v7 = vld [vmem:[%s264_s6] sm:$0xff]  ;;  %s749_s26 = sshll.u32 %s955_s18, 3 }
  0x10   : > { %337 = vmatprep.subr.mxu0 %v901_v6  ;;  %v426_v49 = vadd.s32 8, %v425_v44  ;;  %v427_v50 = vadd.s32 16, %v425_v44  ;;  %v428_v51 = vadd.s32 24, %v425_v44  ;;  %s282_s29 = scalar_lea.vmem %s949_s5, %s749_s26 }
  0x11   : > { %338 = vmatpush1.msra.mxu0 %v903_v7 }
  0x12   : > { %750 = vmatmul.mubr.msk.f32.vlgmr.msra.gmra.mxu0 %vm294_vm0, %v285_v8 }
  0x13   : > { %403 = vperm.xlu0 %804, %v291_v4   ;;  %413 = vperm.xlu1 %805, %v293_v5  }
  0x14   : > { %377 = vmatprep.mubr.f32.mxu0 %v830_v0 }
  0x16   : > { %751 = vmatmul.mubr.msk.f32.gmra.mxu0 %vm294_vm0, %v286_v9 }
  0x17   : > { %383 = vmatprep.mubr.f32.mxu0 %v830_v0 }
  0x1a   : > { %752 = vmatmul.mubr.msk.f32.gmra.mxu0 %vm294_vm0, %v287_v10 }
  0x1b   : > { %389 = vmatprep.mubr.f32.mxu0 %v830_v0 }
  0x1e   : > { %753 = vmatmul.mubr.msk.f32.gmra.mxu0 %vm294_vm0, %v288_v11 }
  0x8a   : > { %v399_v14 = vpop.permute.xlu0 %398  ;;  %v409_v16 = vpop.permute.xlu1 %408 }
  0x8e   : > { %v404_v19 = vpop.permute.xlu0 %403  ;;  %v414_v22 = vpop.permute.xlu1 %413 }
  0xd2   : > { %v373_v12 = vpop.f32.mrf.mxu0 }
  0xd3   : > { %v416_v24 = vadd.f32 %v399_v14, %v373_v12 }
  0xd4   : > { %v375_v13 = vpop.f32.mrf.mxu0 }
  0xd5   : > { %v417_v28 = vadd.f32 %v399_v14, %v375_v13 }
  0xd6   : > { %v379_v15 = vpop.f32.mrf.mxu0 }
  0xd7   : > { %v418_v25 = vadd.f32 %v404_v19, %v379_v15 }
  0xd8   : > { %v381_v17 = vpop.f32.mrf.mxu0 }
  0xd9   : > { %v419_v30 = vadd.f32 %v404_v19, %v381_v17  ;;  %v832_v19 = vmov 1.0  }
  0xda   : > { %v385_v18 = vpop.f32.mrf.mxu0 }
  0xdb   : > { %v420_v21 = vadd.f32 %v409_v16, %v385_v18 }
  0xdc   : > { %v387_v20 = vpop.f32.mrf.mxu0 }
  0xdd   : > { %v421_v26 = vadd.f32 %v409_v16, %v387_v20  ;;  %v429_v31 = vmin.f32 %v416_v24, %v420_v21  ;;  %v289_v20 = vld [vmem:[%s946_s2] sm:$0xff] }
  0xde   : > { %v391_v23 = vpop.f32.mrf.mxu0 }
  0xdf   : > { %v422_v27 = vadd.f32 %v414_v22, %v391_v23  ;;  %v438_v34 = vmin.f32 %v417_v28, %v421_v26 }
  0xe0   : > { %v393_v29 = vpop.f32.mrf.mxu0 }
  0xe1   : > { %v430_v32 = vmin.f32 %v418_v25, %v422_v27  ;;  %v423_v33 = vadd.f32 %v414_v22, %v393_v29 }
  0xe3   : > { %v431_v35 = vmin.f32 %v429_v31, %v430_v32  ;;  %v439_v36 = vmin.f32 %v419_v30, %v423_v33 }
  0xe5   : > { %v432_v37 = vrot.slane %v431_v35, 4  ;;  %v440_v38 = vmin.f32 %v438_v34, %v439_v36 }
  0xe7   : > { %v433_v40 = vmin.f32 %v431_v35, %v432_v37  ;;  %v441_v41 = vrot.slane %v440_v38, 4 }
  0xe9   : > { %v434_v42 = vrot.slane %v433_v40, 2  ;;  %v442_v43 = vmin.f32 %v440_v38, %v441_v41 }
  0xeb   : > { %v435_v45 = vmin.f32 %v433_v40, %v434_v42  ;;  %v443_v46 = vrot.slane %v442_v43, 2 }
  0xed   : > { %v436_v47 = vrot.slane %v435_v45, 1  ;;  %v444_v48 = vmin.f32 %v442_v43, %v443_v46 }
  0xef   : > { %v437_v52 = vmin.f32 %v435_v45, %v436_v47  ;;  %v445_v53 = vrot.slane %v444_v48, 1 }
  0xf1   : > { %vm447_vm1 = vcmp.le.f32.partialorder %v416_v24, %v437_v52  ;;  %vm449_vm2 = vcmp.le.f32.partialorder %v418_v25, %v437_v52  ;;  %vm451_vm3 = vcmp.le.f32.partialorder %v420_v21, %v437_v52  ;;  %vm453_vm4 = vcmp.le.f32.partialorder %v422_v27, %v437_v52 }
  0xf2   : > { %v455_v54 = vsel %vm447_vm1, %v425_v44, 32  ;;  %v457_v55 = vsel %vm449_vm2, %v426_v49, 32  ;;  %v459_v56 = vsel %vm451_vm3, %v427_v50, 32  ;;  %v461_v57 = vsel %vm453_vm4, %v428_v51, 32 }
  0xf3   : > { %vm463_vm5 = vcmp.lt.s32.totalorder %v455_v54, %v459_v56  ;;  %vm465_vm6 = vcmp.lt.s32.totalorder %v457_v55, %v461_v57  ;;  %v446_v58 = vmin.f32 %v444_v48, %v445_v53 }
  0xf4   : > { %v464_v59 = vsel %vm463_vm5, %v455_v54, %v459_v56  ;;  %v466_v60 = vsel %vm465_vm6, %v457_v55, %v461_v57 }
  0xf5   : > { %vm467_vm7 = vcmp.lt.s32.totalorder %v464_v59, %v466_v60  ;;  %vm454_vm8 = vcmp.le.f32.partialorder %v423_v33, %v446_v58  ;;  %vm448_vm9 = vcmp.le.f32.partialorder %v417_v28, %v446_v58  ;;  %vm450_vm10 = vcmp.le.f32.partialorder %v419_v30, %v446_v58 }
  0xf6   : > { %v468_v61 = vsel %vm467_vm7, %v464_v59, %v466_v60  ;;  %vm452_vm11 = vcmp.le.f32.partialorder %v421_v26, %v446_v58  ;;  %v456_v62 = vsel %vm448_vm9, %v425_v44, 32  ;;  %v458_v63 = vsel %vm450_vm10, %v426_v49, 32 }
  0xf7   : > { %v469_v0 = vrot.slane %v468_v61, 4  ;;  %v460_v1 = vsel %vm452_vm11, %v427_v50, 32  ;;  %v462_v2 = vsel %vm454_vm8, %v428_v51, 32 }
  0xf8   : > { %vm478_vm12 = vcmp.lt.s32.totalorder %v456_v62, %v460_v1  ;;  %vm480_vm13 = vcmp.lt.s32.totalorder %v458_v63, %v462_v2 }
  0xf9   : > { %vm470_vm14 = vcmp.lt.s32.totalorder %v468_v61, %v469_v0  ;;  %v479_v3 = vsel %vm478_vm12, %v456_v62, %v460_v1  ;;  %v481_v4 = vsel %vm480_vm13, %v458_v63, %v462_v2  ;;  %vm517_vm12 = vcmask 261120  }
  0xfa   : > { %vm482_vm15 = vcmp.lt.s32.totalorder %v479_v3, %v481_v4  ;;  %v471_v5 = vsel %vm470_vm14, %v468_v61, %v469_v0 }
  0xfb   : > { %v483_v8 = vsel %vm482_vm15, %v479_v3, %v481_v4  ;;  %v472_v9 = vrot.slane %v471_v5, 2 }
  0xfc   : > { %v484_v10 = vrot.slane %v483_v8, 4 }
  0xfd   : > { %vm473_vm0 = vcmp.lt.s32.totalorder %v471_v5, %v472_v9 }
  0xfe   : > { %vm485_vm1 = vcmp.lt.s32.totalorder %v483_v8, %v484_v10  ;;  %v474_v11 = vsel %vm473_vm0, %v471_v5, %v472_v9 }
  0xff   : > { %v486_v12 = vsel %vm485_vm1, %v483_v8, %v484_v10  ;;  %v475_v13 = vrot.slane %v474_v11, 1 }
 0x100   : > { %v487_v14 = vrot.slane %v486_v12, 2 }
 0x101   : > { %vm476_vm3 = vcmp.lt.s32.totalorder %v474_v11, %v475_v13 }
 0x102   : > { %vm488_vm2 = vcmp.lt.s32.totalorder %v486_v12, %v487_v14  ;;  %v477_v17 = vsel %vm476_vm3, %v474_v11, %v475_v13 }
 0x103   : > { %v489_v15 = vsel %vm488_vm2, %v486_v12, %v487_v14  ;;  %vm499_vm6 = vcmp.eq.s32.totalorder %v461_v57, %v477_v17  ;;  %vm497_vm8 = vcmp.eq.s32.totalorder %v459_v56, %v477_v17  ;;  %vm495_vm10 = vcmp.eq.s32.totalorder %v457_v55, %v477_v17 }
 0x104   : > { %v490_v16 = vrot.slane %v489_v15, 1  ;;  %vm493_vm13 = vcmp.eq.s32.totalorder %v455_v54, %v477_v17 }
 0x106   : > { %vm491_vm4 = vcmp.lt.s32.totalorder %v489_v15, %v490_v16 }
 0x107   : > { %v492_v18 = vsel %vm491_vm4, %v489_v15, %v490_v16 }
 0x108   : > { %vm500_vm5 = vcmp.eq.s32.totalorder %v462_v2, %v492_v18  ;;  %vm498_vm7 = vcmp.eq.s32.totalorder %v460_v1, %v492_v18  ;;  %vm496_vm9 = vcmp.eq.s32.totalorder %v458_v63, %v492_v18  ;;  %vm494_vm11 = vcmp.eq.s32.totalorder %v456_v62, %v492_v18 }
 0x109   : > { %762 = vmatprep.subr.msk.mxu1 %vm500_vm5, %v832_v19 }
 0x10a   : > { %763 = vmatpush1.msk.msra.mxu1 %vm499_vm6, %v832_v19 }
 0x10b   : > { %764 = vmatprep.subr.msk.mxu1 %vm498_vm7, %v832_v19 }
 0x10c   : > { %765 = vmatpush1.msk.msra.mxu1 %vm497_vm8, %v832_v19 }
 0x10d   : > { %766 = vmatprep.subr.msk.mxu1 %vm496_vm9, %v832_v19 }
 0x10e   : > { %767 = vmatpush1.msk.msra.mxu1 %vm495_vm10, %v832_v19 }
 0x10f   : > { %768 = vmatprep.subr.msk.mxu1 %vm494_vm11, %v832_v19 }
 0x110   : > { %769 = vmatpush1.msk.msra.mxu1 %vm493_vm13, %v832_v19 }
 0x111   : > { %770 = vmatmul.mubr.msk.f32.vlgmr.msra.gmra.mxu1 %vm517_vm12, %v289_v20 }
 0x1d1   : > { %v587_v21 = vpop.f32.mrf.mxu1 }
 0x1d2   : > { %v592_v22 = vsub.f32 %v587_v21, %v903_v7 }
 0x1d3   : > { %v589_v23 = vpop.f32.mrf.mxu1 }
 0x1d4   : > { %v594_v24 = vadd.f32 %v592_v22, %v903_v7  ;;  %v593_v25 = vsub.f32 %v589_v23, %v901_v6  ;;  %v598_v26 = vmul.f32 %v592_v22, %v592_v22 }
 0x1d6   : > { %596 = vst [vmem:[%s274_s25] sm:$0xff] %v594_v24  ;;  %v595_v27 = vadd.f32 %v593_v25, %v901_v6  ;;  %v599_v28 = vmul.f32 %v593_v25, %v593_v25 }
 0x1d8   : > { %597 = vst [vmem:[%s274_s25 + $0x8] sm:$0xff] %v595_v27  ;;  %v600_v29 = vadd.f32 %v599_v28, %v598_v26 }
 0x1da   : > { %601 = vadd.xlane.f32.xlu0 %v600_v29 }
 0x263   : > { %v602_v30 = vpop.xlane.xlu0 %601 }
 0x264   : > { %v603_v31 = vrot.slane %v602_v30, 4 }
 0x266   : > { %v604_v32 = vadd.f32 %v603_v31, %v602_v30 }
 0x268   : > { %v605_v33 = vrot.slane %v604_v32, 2 }
 0x26a   : > { %v606_v34 = vadd.f32 %v605_v33, %v604_v32 }
 0x26c   : > { %v607_v35 = vrot.slane %v606_v34, 1 }
 0x26e   : > { %v608_v36 = vadd.f32 %v607_v35, %v606_v34 }
 0x270   : > { %775 = vpush %v608_v36 }
 0x2a1   : > { %s776_s30 = spop %775 }
 0x2a2   : > { %v610_v7 = vstv %s776_s30 }
 0x2a3   : > { %611 = vst [vmem:[%s282_s29] sm:$0xff] %v610_v7 }
 0x2a4 PF: > { %s16_s20 = sadd.s32 1, %s828_s20   ;;  %s950_s18 = smov %s824_s19 }
 0x2a5   : > { %p13_p5 = scmp.ge.s32.totalorder %s16_s20, 4   ;;  %s951_s19 = smov %s953_s21 }
 0x2a7   :  { %15 = sbr.rel (!%p13_p5) target bundleno = 2 (0x2), region = 78 }

</bundles_post_ra>
